<compile_context>
chip_gen: v6e
topology: v6e:2x2x1
jax: 0.10.0
libtpu: 0.0.40
codegen_flags: <defaults>
</compile_context>

<pallas_src>
import jax
import jax.numpy as jnp
from jax.experimental import pallas as pl
from jax.experimental.pallas import tpu as pltpu


def _coord_att_kernel(x_ref, w_ref, b_ref, e_ref, o_ref):
    # Gate path: mean-pool over S, 1x1 conv, bias and BN are all pre-folded
    # into w_ref / b_ref on the host -> one (TB, C*S) @ (C*S, MIPP) matmul.
    # x feeds the MXU in its native dtype; accumulation is f32.
    y = jnp.dot(x_ref[...], w_ref[...],
                preferred_element_type=jnp.float32) + b_ref[...]        # (TB, MIPP)
    # h_sigmoid: relu6(y + 3) / 6
    y = jnp.minimum(jnp.maximum(y + 3.0, 0.0), 6.0) * (1.0 / 6.0)
    # Broadcast each channel gate over its S slots via a 0/1 expansion matrix
    # (keeps lanes dense, no cross-lane reshape; padded lanes hit zero rows).
    gate = jnp.dot(y, e_ref[...], preferred_element_type=jnp.float32)   # (TB, C*S)
    # Single multiply (f32) + single cast to the output dtype.
    o_ref[...] = (x_ref[...] * gate).astype(o_ref.dtype)


def _pick_block_n(n, *, sublane=8, max_rows=8192):
    """Rows per grid step.

    Up to `max_rows` rows (4 MiB f32 blocks at CS=128) to amortize the
    ~0.35us per-step pipeline overhead, while keeping the grid at an even
    number of steps (>= 2 when possible) so v7x's two TensorCores split the
    "parallel" axis evenly.  `sublane` is 8 for 4-byte, 16 for 2-byte dtypes.
    """
    if n <= sublane:
        return n                                  # block == full dim, always legal
    rup = lambda v: -(-v // sublane) * sublane
    if n <= 2 * max_rows:
        return min(rup(-(-n // 2)), rup(n))       # exactly 2 (even) steps
    steps = -(-n // max_rows)
    steps += steps % 2                            # round step count up to even
    return rup(-(-n // steps))


def _tpu_vmem_limit_bytes():
    """Generation-aware scoped-VMEM limit (v5e/v6e: 128 MiB phys; v7x: 64 MiB)."""
    phys = None
    try:
        info = pltpu.get_tpu_info()
        for attr in ("vmem_capacity_bytes", "vmem_size_bytes", "vmem_bytes"):
            v = getattr(info, attr, None)
            if v:
                phys = int(v)
                break
    except Exception:
        phys = None
    if phys is not None and phys >= 100 * (1 << 20):
        return 64 * (1 << 20)      # v5e / v6e: plenty of headroom
    return 48 * (1 << 20)          # v7x (64 MiB physical) or unknown: stay safe


def coord_att(x, w, b, gamma, beta, running_mean, running_var, *, eps=1e-5,
              block_n=None):
    """x: (N, C, S).  w: (mip, C) squeezed 1x1-conv weight, b: (mip,).
    gamma/beta/running_mean/running_var: (mip,) BatchNorm1d (inference) stats."""
    N, C, S = x.shape
    mip = w.shape[0]
    # TODO(synk): the broadcast `identity * y` in the reference only type-checks
    # when mip == C (true for inp == 8); other CoordAtt configs are rejected.
    assert mip == C, "gate channel count must equal input channels (use inp=8)"
    CS = C * S
    f32 = jnp.float32
    itemsize = x.dtype.itemsize

    # ---- host-side folding (tiny one-time ops) ------------------------------
    scale = gamma.astype(f32) * jax.lax.rsqrt(running_var.astype(f32) + eps)
    w_scaled = w.astype(f32) * scale[:, None]                         # (mip, C)
    # W_big[c*S + s, m] = w_scaled[m, c] / S  (mean-pool folded into the matmul)
    w_big = jnp.kron(w_scaled.T, jnp.ones((S, 1), f32) / S)           # (C*S, mip)
    b_fold = ((b.astype(f32) - running_mean.astype(f32)) * scale
              + beta.astype(f32))                                     # (mip,)
    # E[m, c*S + s] = 1 iff c == m : broadcasts each gate value over its S slots.
    expand = jnp.kron(jnp.eye(C, dtype=f32), jnp.ones((1, S), f32))   # (mip, C*S)

    # Zero-pad mip up to a lane-dense multiple of 128.  Padded columns of W/b
    # are zero, so padded y lanes are h_sigmoid(0) = 0.5, but the matching
    # rows of E are all-zero -> they contribute exactly nothing to the gate.
    mipp = -(-mip // 128) * 128
    w_pad = jnp.zeros((CS, mipp), f32).at[:, :mip].set(w_big)
    b_pad = jnp.zeros((1, mipp), f32).at[:, :mip].set(b_fold[None, :])
    e_pad = jnp.zeros((mipp, CS), f32).at[:mip, :].set(expand)
    if itemsize < 4:
        # bf16/fp8 x: let the MXU consume both operands natively (no full-slab
        # widening of x inside the kernel); accumulation stays f32.
        w_pad = w_pad.astype(x.dtype)

    x2 = x.reshape(N, CS)                                             # lane-dense view
    sublane = max(8, 32 // itemsize)
    tb = block_n if block_n is not None else _pick_block_n(N, sublane=sublane)
    vmem_limit = _tpu_vmem_limit_bytes()

    out2 = pl.pallas_call(
        _coord_att_kernel,
        out_shape=jax.ShapeDtypeStruct((N, CS), x.dtype),
        grid=(pl.cdiv(N, tb),),
        in_specs=[
            pl.BlockSpec((tb, CS), lambda i: (i, 0)),                 # x slab
            pl.BlockSpec((CS, mipp), lambda i: (0, 0)),               # folded weight
            pl.BlockSpec((1, mipp), lambda i: (0, 0)),                # folded bias
            pl.BlockSpec((mipp, CS), lambda i: (0, 0)),               # gate expansion
        ],
        # When N % tb != 0 the trailing rows of the last block are padding:
        # their gates are computed on garbage but the out-of-range output
        # writes are dropped, so results stay correct.
        out_specs=pl.BlockSpec((tb, CS), lambda i: (i, 0)),
        compiler_params=pltpu.CompilerParams(
            dimension_semantics=("parallel",),
            vmem_limit_bytes=vmem_limit),
        cost_estimate=pl.CostEstimate(
            flops=N * (2 * CS * mipp + 2 * mipp * CS + CS),
            transcendentals=0,
            bytes_accessed=2 * N * CS * itemsize),
    )(x2, w_pad, b_pad, e_pad)
    return out2.reshape(N, C, S)


if __name__ == "__main__":
    key = jax.random.PRNGKey(0)
    N, C, S = 2, 8, 16                 # inp = 8  ->  mip = max(8, 8 // 32) = 8
    mip = max(8, C // 32)

    k_x, k_w, k_b, k_g, k_beta = jax.random.split(key, 5)
    x = jax.random.normal(k_x, (N, C, S), dtype=jnp.float32)
    # conv1 = nn.Conv1d(inp, mip, kernel_size=1): weight (mip, C, 1) -> (mip, C)
    w = 0.1 * jax.random.normal(k_w, (mip, C), dtype=jnp.float32)
    b = 0.1 * jax.random.normal(k_b, (mip,), dtype=jnp.float32)
    # bn1 parameters (inference-mode running stats)
    gamma = 1.0 + 0.1 * jax.random.normal(k_g, (mip,), dtype=jnp.float32)
    beta = 0.1 * jax.random.normal(k_beta, (mip,), dtype=jnp.float32)
    running_mean = 0.05 * jnp.arange(mip, dtype=jnp.float32)
    running_var = 1.0 + 0.1 * jnp.arange(mip, dtype=jnp.float32)
    eps = 1e-5

    def ref_fn(xv):
        # pure-JAX reference of the same (fixed) semantics, unfolded
        x_t = jnp.mean(xv, axis=-1)                                   # pool_t
        y = x_t @ w.T + b                                             # conv1 (1x1)
        y = (y - running_mean) / jnp.sqrt(running_var + eps) * gamma + beta  # bn1
        y = jnp.clip(y + 3.0, 0.0, 6.0) / 6.0                         # h_sigmoid
        return xv * y[:, :, None]

    # Small shape from the module spec (single grid step).
    out = coord_att(x, w, b, gamma, beta, running_mean, running_var, eps=eps)
    out = jax.block_until_ready(out)
    assert out.shape == (N, C, S)
    # 1e-4 leaves margin for MXU accumulation-order differences; real bugs
    # (wrong fold / wrong broadcast) produce errors >= 1e-2.
    err = float(jnp.max(jnp.abs(out - ref_fn(x))))
    assert err < 1e-4, err

    # Larger batch: exercises the multi-step even grid and the partial last
    # block (N2 not a multiple of the chosen block rows -> OOB writes dropped).
    N2 = 1000
    x_big = jax.random.normal(jax.random.PRNGKey(1), (N2, C, S), dtype=jnp.float32)
    out_big = jax.block_until_ready(
        coord_att(x_big, w, b, gamma, beta, running_mean, running_var, eps=eps))
    err_big = float(jnp.max(jnp.abs(out_big - ref_fn(x_big))))
    assert err_big < 1e-4, err_big

    print("KERNEL_OK")
</pallas_src>

<mosaic_0001>
module attributes {stable_mosaic.version = 11 : i64} {
  func.func @_coord_att_kernel(%arg0: i32, %arg1: memref<2x128xf32, #tpu.memory_space<vmem>>, %arg2: memref<128x128xf32, #tpu.memory_space<vmem>>, %arg3: memref<1x128xf32, #tpu.memory_space<vmem>>, %arg4: memref<128x128xf32, #tpu.memory_space<vmem>>, %arg5: memref<2x128xf32, #tpu.memory_space<vmem>>) attributes {dimension_semantics = [#tpu.dimension_semantics<parallel>], iteration_bounds = array<i64: 1>, scalar_prefetch = 0 : i64, scratch_operands = 0 : i64, tpu.core_type = #tpu.core_type<tc>, window_params = [{transform_indices = @transform_0, window_bounds = array<i64: 2, 128>}, {pipeline_mode = #tpu.pipeline_mode<synchronous>, transform_indices = @transform_1, window_bounds = array<i64: 128, 128>}, {pipeline_mode = #tpu.pipeline_mode<synchronous>, transform_indices = @transform_2, window_bounds = array<i64: 1, 128>}, {pipeline_mode = #tpu.pipeline_mode<synchronous>, transform_indices = @transform_3, window_bounds = array<i64: 128, 128>}, {transform_indices = @transform_4, window_bounds = array<i64: 2, 128>}]} {
    %c0 = arith.constant 0 : index
    %c0_0 = arith.constant 0 : index
    %0 = vector.load %arg1[%c0, %c0_0] : memref<2x128xf32, #tpu.memory_space<vmem>>, vector<2x128xf32>
    %c0_1 = arith.constant 0 : index
    %c0_2 = arith.constant 0 : index
    %1 = vector.load %arg2[%c0_1, %c0_2] : memref<128x128xf32, #tpu.memory_space<vmem>>, vector<128x128xf32>
    %cst = arith.constant dense<0.000000e+00> : vector<2x128xf32>
    %2 = tpu.matmul %0, %1, %cst {dimension_numbers = #tpu.dot_dimension_numbers<[1], [0], [0], [1], [0, 0, 1, 1], [], []>} : vector<2x128xf32>, vector<128x128xf32>, vector<2x128xf32> -> vector<2x128xf32>
    %c0_3 = arith.constant 0 : index
    %c0_4 = arith.constant 0 : index
    %3 = vector.load %arg3[%c0_3, %c0_4] : memref<1x128xf32, #tpu.memory_space<vmem>>, vector<1x128xf32>
    %4 = vector.broadcast %3 : vector<1x128xf32> to vector<2x128xf32>
    %5 = arith.addf %2, %4 : vector<2x128xf32>
    %cst_5 = arith.constant 3.000000e+00 : f32
    %6 = vector.broadcast %cst_5 : f32 to vector<2x128xf32>
    %7 = arith.addf %5, %6 : vector<2x128xf32>
    %cst_6 = arith.constant 0.000000e+00 : f32
    %8 = vector.broadcast %cst_6 : f32 to vector<2x128xf32>
    %9 = arith.maximumf %7, %8 : vector<2x128xf32>
    %cst_7 = arith.constant 6.000000e+00 : f32
    %10 = vector.broadcast %cst_7 : f32 to vector<2x128xf32>
    %11 = arith.minimumf %9, %10 : vector<2x128xf32>
    %cst_8 = arith.constant 0.166666672 : f32
    %12 = vector.broadcast %cst_8 : f32 to vector<2x128xf32>
    %13 = arith.mulf %11, %12 : vector<2x128xf32>
    %c0_9 = arith.constant 0 : index
    %c0_10 = arith.constant 0 : index
    %14 = vector.load %arg4[%c0_9, %c0_10] : memref<128x128xf32, #tpu.memory_space<vmem>>, vector<128x128xf32>
    %cst_11 = arith.constant dense<0.000000e+00> : vector<2x128xf32>
    %15 = tpu.matmul %13, %14, %cst_11 {dimension_numbers = #tpu.dot_dimension_numbers<[1], [0], [0], [1], [0, 0, 1, 1], [], []>} : vector<2x128xf32>, vector<128x128xf32>, vector<2x128xf32> -> vector<2x128xf32>
    %c0_12 = arith.constant 0 : index
    %c0_13 = arith.constant 0 : index
    %16 = vector.load %arg1[%c0_12, %c0_13] : memref<2x128xf32, #tpu.memory_space<vmem>>, vector<2x128xf32>
    %17 = arith.mulf %16, %15 : vector<2x128xf32>
    %c0_14 = arith.constant 0 : index
    %c0_15 = arith.constant 0 : index
    %18 = vector.load %arg5[%c0_14, %c0_15] : memref<2x128xf32, #tpu.memory_space<vmem>>, vector<2x128xf32>
    tpu.vector_store %arg5[%c0_14, %c0_15], %17 {strides = array<i32>} : memref<2x128xf32, #tpu.memory_space<vmem>>, vector<2x128xf32>,
    return
  }
  func.func @transform_0(%arg0: i32) -> (i32, i32) {
    %c0_i32 = arith.constant 0 : i32
    %c0_i32_0 = arith.constant 0 : i32
    return %arg0, %c0_i32 : i32, i32
  }
  func.func @transform_1(%arg0: i32) -> (i32, i32) {
    %c0_i32 = arith.constant 0 : i32
    %c0_i32_0 = arith.constant 0 : i32
    %c0_i32_1 = arith.constant 0 : i32
    return %c0_i32, %c0_i32_0 : i32, i32
  }
  func.func @transform_2(%arg0: i32) -> (i32, i32) {
    %c0_i32 = arith.constant 0 : i32
    %c0_i32_0 = arith.constant 0 : i32
    %c0_i32_1 = arith.constant 0 : i32
    return %c0_i32, %c0_i32_0 : i32, i32
  }
  func.func @transform_3(%arg0: i32) -> (i32, i32) {
    %c0_i32 = arith.constant 0 : i32
    %c0_i32_0 = arith.constant 0 : i32
    %c0_i32_1 = arith.constant 0 : i32
    return %c0_i32, %c0_i32_0 : i32, i32
  }
  func.func @transform_4(%arg0: i32) -> (i32, i32) {
    %c0_i32 = arith.constant 0 : i32
    %c0_i32_0 = arith.constant 0 : i32
    return %arg0, %c0_i32 : i32, i32
  }
}

</mosaic_0001>

<bundles_post_ra>
// kernel: tpu_custom_call.1
= control target key start
LH: loop header
LB: loop body
LE: loop exit
PB: predicated region body
PF: predicated region fallthrough
CT: control target
= control target key end

     0   :  { %9 = vsyncpa [#allocation3], 0  ;;  %s540_s0 = inlined_call_operand.hbm [shape: f32[2,128], index: 0, kind: input, shape index: {}]   ;;  %s541_s1 = inlined_call_operand.hbm [shape: f32[128,128], index: 1, kind: input, shape index: {}]   ;;  %s542_s2 = inlined_call_operand.vmem [shape: f32[1,128], index: 2, kind: input, shape index: {}]   ;;  %s543_s3 = inlined_call_operand.hbm [shape: f32[128,128], index: 3, kind: input, shape index: {}]   ;;  %s544_s4 = inlined_call_operand.hbm [shape: f32[2,128], index: 4, kind: output, shape index: {}]  }
   0x1   :  { %10 = vsyncpa [#allocation6], 0 }
   0x2   :  { %11 = vsyncpa [#allocation4], 0  ;;  %s458_s15 = smov [#allocation5]  }
   0x3   :  { %s27_s16 = sshll.u32 %s458_s15, 4  ;;  %s28_s16 = int_to_ptr.vmem [resolvable:$true] %s27_s16 }
   0x4   :  { %s380_s17 = scalar_lea.vmem %s28_s16, 2048  ;;  %p385_p1 = scmp.lt.s32.totalorder %s28_s16, %s28_s16 }
   0x5   :  { %p381_p0 = scmp.ne.s32.totalorder %s28_s16, %s380_s17  ;;  %p386_p2 = scmp.lt.s32.totalorder %s380_s17, %s380_s17 }
   0x7   :  { %p387_p3 = por %p386_p2, %p385_p1 }
   0x9   :  { %p388_p4 = pnand %p387_p3, %p381_p0 }
   0xb   :  { %391 = shalt.err (!%p388_p4)
}
   0xc   :  { %s459_s18 = smov 128   ;;  %s460_s19 = smov 8  }
   0xd   :  { %33 = dma.hbm_to_vmem [thread:$0]  %s541_s1, 2048, %s28_s16, [#allocation6], %s459_s18, %s459_s18, %s460_s19  }
   0xe   :  { %s461_s22 = smov [#allocation2]   ;;  %s462_s24 = smov [#allocation7]  }
   0xf   :  { %s18_s23 = sshll.u32 %s461_s22, 4  ;;  %s41_s25 = sshll.u32 %s462_s24, 4  ;;  %s19_s23 = int_to_ptr.vmem [resolvable:$true] %s18_s23  ;;  %s42_s25 = int_to_ptr.vmem [resolvable:$true] %s41_s25 }
  0x10   :  { %s400_s26 = scalar_lea.vmem %s19_s23, 32  ;;  %p405_p6 = scmp.lt.s32.totalorder %s19_s23, %s19_s23 }
  0x11   :  { %p401_p5 = scmp.ne.s32.totalorder %s19_s23, %s400_s26  ;;  %p406_p7 = scmp.lt.s32.totalorder %s400_s26, %s400_s26 }
  0x13   :  { %p407_p8 = por %p406_p7, %p405_p6 }
  0x15   :  { %p408_p9 = pnand %p407_p8, %p401_p5 }
  0x17   :  { %411 = shalt.err (!%p408_p9)
}
  0x18   :  { %21 = dma.hbm_to_vmem [thread:$0]  %s540_s0, 32, %s19_s23, [#allocation3]  }
  0x19   :  { %s420_s29 = scalar_lea.vmem %s42_s25, 2048  ;;  %p425_p11 = scmp.lt.s32.totalorder %s42_s25, %s42_s25 }
  0x1a   :  { %p421_p10 = scmp.ne.s32.totalorder %s42_s25, %s420_s29  ;;  %p426_p12 = scmp.lt.s32.totalorder %s420_s29, %s420_s29 }
  0x1c   :  { %p427_p13 = por %p426_p12, %p425_p11 }
  0x1e   :  { %p428_p0 = pnand %p427_p13, %p421_p10 }
  0x20   :  { %431 = shalt.err (!%p428_p0)
}
  0x21   :  { %47 = dma.hbm_to_vmem [thread:$0]  %s543_s3, 2048, %s42_s25, [#allocation6], %s459_s18, %s459_s18, %s460_s19  }
  0x22   :  { %452 = dma.done.wait [#allocation3], 32  }
  0x23   :  { %453 = vsyncadd [#allocation3], 4294967264 }
  0x24   :  { %454 = dma.done.wait [#allocation6], 4096  }
  0x25   :  { %455 = vsyncadd [#allocation6], 4294963200  ;;  %v463_v0 = vmov 0.0   ;;  %vm464_vm0 = vmmov 0   ;;  %v73_v1 = vld [vmem:[#allocation5 + $0x78] sm:$0xff]  ;;  %v72_v2 = vld [vmem:[#allocation5 + $0x70] sm:$0xff] }
  0x26   :  { %294 = vmatprep.subr.mxu0 %v463_v0  ;;  %326 = vmatprep.mubr.msk.f32.mxu0 %vm464_vm0, %v463_v0  ;;  %v71_v3 = vld [vmem:[#allocation5 + $0x68] sm:$0xff]  ;;  %v70_v4 = vld [vmem:[#allocation5 + $0x60] sm:$0xff]  ;;  %v170_v5 = vld [vmem:[#allocation7 + $0x78] sm:$0xff]  ;;  %s465_s5 = smov [#allocation8]  }
  0x27   :  { %329 = vmatprep.subr.mxu1 %v463_v0  ;;  %361 = vmatprep.mubr.msk.f32.mxu1 %vm464_vm0, %v463_v0  ;;  %v69_v6 = vld [vmem:[#allocation5 + $0x58] sm:$0xff]  ;;  %v169_v7 = vld [vmem:[#allocation7 + $0x70] sm:$0xff]  ;;  %v168_v8 = vld [vmem:[#allocation7 + $0x68] sm:$0xff]  ;;  %s249_s6 = sshll.u32 %s465_s5, 4  ;;  %s250_s6 = int_to_ptr.vmem [resolvable:$true] %s249_s6 }
  0x28   :  { %295 = vmatpush3.msra.mxu0 %v73_v1  ;;  %330 = vmatpush3.msra.mxu1 %v170_v5  ;;  %v68_v9 = vld [vmem:[#allocation5 + $0x50] sm:$0xff]  ;;  %v167_v10 = vld [vmem:[#allocation7 + $0x60] sm:$0xff]  ;;  %v67_v11 = vld [vmem:[#allocation5 + $0x48] sm:$0xff]  ;;  %s432_s7 = scalar_lea.vmem %s250_s6, 32  ;;  %p437_p2 = scmp.lt.s32.totalorder %s250_s6, %s250_s6 }
  0x29   :  { %296 = vmatprep.subr.mxu0 %v463_v0  ;;  %331 = vmatprep.subr.mxu1 %v463_v0  ;;  %v166_v12 = vld [vmem:[#allocation7 + $0x58] sm:$0xff]  ;;  %v66_v13 = vld [vmem:[#allocation5 + $0x40] sm:$0xff]  ;;  %v165_v14 = vld [vmem:[#allocation7 + $0x50] sm:$0xff]  ;;  %p433_p1 = scmp.ne.s32.totalorder %s250_s6, %s432_s7  ;;  %p438_p3 = scmp.lt.s32.totalorder %s432_s7, %s432_s7 }
  0x2a   :  { %297 = vmatpush3.msra.mxu0 %v72_v2  ;;  %332 = vmatpush3.msra.mxu1 %v169_v7  ;;  %v65_v15 = vld [vmem:[#allocation5 + $0x38] sm:$0xff]  ;;  %v164_v16 = vld [vmem:[#allocation7 + $0x48] sm:$0xff]  ;;  %v64_v17 = vld [vmem:[#allocation5 + $0x30] sm:$0xff] }
  0x2b   :  { %298 = vmatprep.subr.mxu0 %v463_v0  ;;  %333 = vmatprep.subr.mxu1 %v463_v0  ;;  %v163_v18 = vld [vmem:[#allocation7 + $0x40] sm:$0xff]  ;;  %v63_v19 = vld [vmem:[#allocation5 + $0x28] sm:$0xff]  ;;  %v162_v20 = vld [vmem:[#allocation7 + $0x38] sm:$0xff]  ;;  %p439_p4 = por %p438_p3, %p437_p2 }
  0x2c   :  { %299 = vmatpush3.msra.mxu0 %v71_v3  ;;  %334 = vmatpush3.msra.mxu1 %v168_v8  ;;  %v62_v21 = vld [vmem:[#allocation5 + $0x20] sm:$0xff]  ;;  %v161_v22 = vld [vmem:[#allocation7 + $0x30] sm:$0xff]  ;;  %v61_v23 = vld [vmem:[#allocation5 + $0x18] sm:$0xff] }
  0x2d   :  { %300 = vmatprep.subr.mxu0 %v463_v0  ;;  %335 = vmatprep.subr.mxu1 %v463_v0  ;;  %v60_v24 = vld [vmem:[#allocation5 + $0x10] sm:$0xff]  ;;  %v59_v25 = vld [vmem:[#allocation5 + $0x8] sm:$0xff]  ;;  %v58_v26 = vld [vmem:[#allocation5] sm:$0xff]  ;;  %p440_p5 = pnand %p439_p4, %p433_p1 }
  0x2e   :  { %301 = vmatpush3.msra.mxu0 %v70_v4  ;;  %336 = vmatpush3.msra.mxu1 %v167_v10  ;;  %v57_v27 = vld [vmem:[#allocation2] sm:$0x3]  ;;  %v160_v28 = vld [vmem:[#allocation7 + $0x28] sm:$0xff]  ;;  %v159_v29 = vld [vmem:[#allocation7 + $0x20] sm:$0xff] }
  0x2f   :  { %302 = vmatprep.subr.mxu0 %v463_v0  ;;  %337 = vmatprep.subr.mxu1 %v463_v0  ;;  %v158_v30 = vld [vmem:[#allocation7 + $0x18] sm:$0xff]  ;;  %v157_v31 = vld [vmem:[#allocation7 + $0x10] sm:$0xff]  ;;  %v156_v32 = vld [vmem:[#allocation7 + $0x8] sm:$0xff] }
  0x30   :  { %303 = vmatpush3.msra.mxu0 %v69_v6  ;;  %338 = vmatpush3.msra.mxu1 %v166_v12  ;;  %v155_v33 = vld [vmem:[#allocation7] sm:$0xff]  ;;  %v259_v34 = vld [vmem:[%s542_s2] ss:$0 sm:$0xff] }
  0x31   :  { %304 = vmatprep.subr.mxu0 %v463_v0  ;;  %339 = vmatprep.subr.mxu1 %v463_v0 }
  0x32   :  { %305 = vmatpush3.msra.mxu0 %v68_v9  ;;  %340 = vmatpush3.msra.mxu1 %v165_v14 }
  0x33   :  { %306 = vmatprep.subr.mxu0 %v463_v0  ;;  %341 = vmatprep.subr.mxu1 %v463_v0 }
  0x34   :  { %307 = vmatpush3.msra.mxu0 %v67_v11  ;;  %342 = vmatpush3.msra.mxu1 %v164_v16 }
  0x35   :  { %308 = vmatprep.subr.mxu0 %v463_v0  ;;  %343 = vmatprep.subr.mxu1 %v463_v0 }
  0x36   :  { %309 = vmatpush3.msra.mxu0 %v66_v13  ;;  %344 = vmatpush3.msra.mxu1 %v163_v18 }
  0x37   :  { %310 = vmatprep.subr.mxu0 %v463_v0  ;;  %345 = vmatprep.subr.mxu1 %v463_v0 }
  0x38   :  { %311 = vmatpush3.msra.mxu0 %v65_v15  ;;  %346 = vmatpush3.msra.mxu1 %v162_v20 }
  0x39   :  { %312 = vmatprep.subr.mxu0 %v463_v0  ;;  %347 = vmatprep.subr.mxu1 %v463_v0 }
  0x3a   :  { %313 = vmatpush3.msra.mxu0 %v64_v17  ;;  %348 = vmatpush3.msra.mxu1 %v161_v22 }
  0x3b   :  { %314 = vmatprep.subr.mxu0 %v463_v0  ;;  %349 = vmatprep.subr.mxu1 %v463_v0 }
  0x3c   :  { %315 = vmatpush3.msra.mxu0 %v63_v19  ;;  %350 = vmatpush3.msra.mxu1 %v160_v28 }
  0x3d   :  { %316 = vmatprep.subr.mxu0 %v463_v0  ;;  %351 = vmatprep.subr.mxu1 %v463_v0 }
  0x3e   :  { %317 = vmatpush3.msra.mxu0 %v62_v21  ;;  %352 = vmatpush3.msra.mxu1 %v159_v29 }
  0x3f   :  { %318 = vmatprep.subr.mxu0 %v463_v0  ;;  %353 = vmatprep.subr.mxu1 %v463_v0 }
  0x40   :  { %319 = vmatpush3.msra.mxu0 %v61_v23  ;;  %354 = vmatpush3.msra.mxu1 %v158_v30 }
  0x41   :  { %320 = vmatprep.subr.mxu0 %v463_v0  ;;  %355 = vmatprep.subr.mxu1 %v463_v0 }
  0x42   :  { %321 = vmatpush3.msra.mxu0 %v60_v24  ;;  %356 = vmatpush3.msra.mxu1 %v157_v31 }
  0x43   :  { %322 = vmatprep.subr.mxu0 %v463_v0  ;;  %357 = vmatprep.subr.mxu1 %v463_v0 }
  0x44   :  { %323 = vmatpush3.msra.mxu0 %v59_v25  ;;  %358 = vmatpush3.msra.mxu1 %v156_v32 }
  0x45   :  { %324 = vmatprep.subr.mxu0 %v463_v0  ;;  %359 = vmatprep.subr.mxu1 %v463_v0 }
  0x46   :  { %325 = vmatpush3.msra.mxu0 %v58_v26  ;;  %360 = vmatpush3.msra.mxu1 %v155_v33 }
  0x47   :  { %327 = vmatmul.mubr.f32.vlgmr.msra.gmra.mxu0 %v57_v27 }
 0x107   :  { %v147_v35 = vpop.f32.mrf.mxu0 }
 0x108   :  { %v148_v36 = vadd.f32 %v259_v34, %v147_v35 }
 0x109   :  { %v328_v37 = vpop.f32.mrf.mxu0 }
 0x10a   :  { %v151_v38 = vadd.f32 3.0, %v148_v36 }
 0x10c   :  { %v152_v39 = vmax.f32 %v151_v38, 0.0 }
 0x10e   :  { %v153_v40 = vmin.f32 %v152_v39, 6.0 }
 0x110   :  { %v154_v41 = vmul.f32 0.16666667, %v153_v40 }
 0x112   :  { %362 = vmatmul.mubr.f32.vlgmr.msra.gmra.mxu1 %v154_v41 }
 0x1d2   :  { %v237_v42 = vpop.f32.mrf.mxu1 }
 0x1d3   :  { %v241_v43 = vmul.f32 %v237_v42, %v57_v27 }
 0x1d4   :  { %v363_v44 = vpop.f32.mrf.mxu1 }
 0x1d5   :  { %242 = vst [vmem:[#allocation8] sm:$0x3] %v241_v43 }
 0x1d6   :  { %443 = shalt.err (!%p440_p5)
}
 0x1d7   :  { %252 = dma.vmem_to_hbm [thread:$0]  %s250_s6, 32, %s544_s4, [#allocation4]  }
 0x1d8   :  { %456 = dma.done.wait [#allocation4], 32  }
 0x1d9   :  { %457 = vsyncadd [#allocation4], 4294967264 }
 0x1da   :  { %256 = vsyncpa [#allocation3], 1 }
 0x1db   :  { %257 = vsyncpa [#allocation6], 1 }
 0x1dc   :  { %258 = vsyncpa [#allocation4], 1 }

</bundles_post_ra>
